<compile_context>
chip_gen: v5e
topology: v5e:2x2
jax: 0.10.0
libtpu: 0.0.40
codegen_flags: <defaults>
</compile_context>

<pallas_src>
import functools
import math

import jax
import jax.numpy as jnp
from jax.experimental import pallas as pl
from jax.experimental.pallas import tpu as pltpu


def _round_up(v: int, m: int) -> int:
    return ((v + m - 1) // m) * m


# ----------------------------------------------------------------------------
# PositionalEncoding buffer setup (plain JAX glue, mirrors torch __init__)
# ----------------------------------------------------------------------------
def make_positional_encoding_table(d_model: int, max_len: int = 5000) -> jnp.ndarray:
    """Returns pe of shape (max_len, d_model) (torch buffer is (max_len, 1, d_model))."""
    position = jnp.arange(0, max_len, dtype=jnp.float32)[:, None]            # (L, 1)
    div_term = jnp.exp(
        jnp.arange(0, d_model, 2, dtype=jnp.float32) * (-math.log(10000.0) / d_model)
    )                                                                         # (D/2,)
    angles = position * div_term                                              # (L, D/2)
    pe = jnp.zeros((max_len, d_model), dtype=jnp.float32)
    pe = pe.at[:, 0::2].set(jnp.sin(angles))
    pe = pe.at[:, 1::2].set(jnp.cos(angles))
    return pe


# ----------------------------------------------------------------------------
# PositionalEncoding kernels.
# 3-D blocks: x/out (seq_tile, B, D_pad), pe (seq_tile, 1, D_pad).
# The add broadcasts pe over the batch (sublane) axis -> no lane replication.
# ----------------------------------------------------------------------------
def _pe_add_kernel(x_ref, pe_ref, o_ref):
    o_ref[...] = (x_ref[...] + pe_ref[...]).astype(o_ref.dtype)


def _pe_add_dropout_kernel(x_ref, pe_ref, m_ref, o_ref, *, scale: float):
    # m_ref is a compact int8 keep-mask (0 = dropped, 1 = kept); the inverted
    # dropout scale 1/(1-p) is a compile-time constant, expanded on the VPU.
    keep = (m_ref[...].astype(jnp.float32) * scale).astype(x_ref.dtype)
    o_ref[...] = ((x_ref[...] + pe_ref[...]) * keep).astype(o_ref.dtype)


def _pick_seq_tile(S: int, row_bytes: int, sublane: int = 8,
                   target_block_bytes: int = 4 * 2**20) -> int:
    """Largest multiple-of-`sublane` row count with block size near ~4 MiB
    (HBM-bound op; bigger tiles amortize the ~0.35 us per-grid-step overhead
    while keeping 3 double-buffered streams well under v7x's 64 MiB VMEM)."""
    if S <= sublane:
        return S
    rows = int(target_block_bytes // max(row_bytes, 1))
    rows = max(sublane, (rows // sublane) * sublane)
    return min(S, rows)


def positional_encoding_forward(
    x: jnp.ndarray,          # (S, B, D), seq-first layout of nn.Transformer
    pe_table: jnp.ndarray,   # (max_len, D) or torch-style (max_len, 1, D)
    *,
    p: float = 0.1,
    training: bool = False,
    rng_key=None,
    seq_tile: int | None = None,
) -> jnp.ndarray:
    S, B, D = x.shape
    if pe_table.ndim == 3:                       # accept the torch buffer layout
        pe_table = pe_table[:, 0, :]
    assert pe_table.shape[0] >= S and pe_table.shape[1] == D

    dt = x.dtype
    itemsize = jnp.dtype(dt).itemsize
    sub = 8 if itemsize >= 4 else 16             # bf16 packs 2 rows per sublane

    # Lane-dense last dim: pad D up to a multiple of 128, slice off at the end.
    D_p = _round_up(D, 128)
    x_p = x if D_p == D else jnp.pad(x, ((0, 0), (0, 0), (0, D_p - D)))
    pe = pe_table[:S].astype(dt)                 # keep native dtype (bf16 halves traffic)
    if D_p != D:
        pe = jnp.pad(pe, ((0, 0), (0, D_p - D)))
    pe = pe.reshape(S, 1, D_p)

    if seq_tile is None:
        seq_tile = _pick_seq_tile(S, B * D_p * itemsize, sublane=sub)
    grid = (pl.cdiv(S, seq_tile),)

    x_spec = pl.BlockSpec((seq_tile, B, D_p), lambda i: (i, 0, 0))
    pe_spec = pl.BlockSpec((seq_tile, 1, D_p), lambda i: (i, 0, 0))
    out_shape = jax.ShapeDtypeStruct((S, B, D_p), dt)
    compiler_params = pltpu.CompilerParams(
        dimension_semantics=("parallel",),       # independent tiles -> 2-TC shard on v7x
        vmem_limit_bytes=48 * 1024 * 1024,       # <= 48 MiB keeps v7x (64 MiB) safe
    )

    apply_dropout = training and p > 0.0
    if not apply_dropout:
        y = pl.pallas_call(
            _pe_add_kernel,
            out_shape=out_shape,
            grid_spec=pl.GridSpec(grid=grid, in_specs=[x_spec, pe_spec], out_specs=x_spec),
            compiler_params=compiler_params,
        )(x_p, pe)
        return y[..., :D] if D_p != D else y

    if p >= 1.0:                                 # degenerate dropout: everything dropped
        return jnp.zeros_like(x)
    if rng_key is None:
        rng_key = jax.random.PRNGKey(0)
    keep = jax.random.bernoulli(rng_key, 1.0 - p, (S, B, D)).astype(jnp.int8)
    if D_p != D:
        keep = jnp.pad(keep, ((0, 0), (0, 0), (0, D_p - D)))
    m_spec = pl.BlockSpec((seq_tile, B, D_p), lambda i: (i, 0, 0))

    y = pl.pallas_call(
        functools.partial(_pe_add_dropout_kernel, scale=float(1.0 / (1.0 - p))),
        out_shape=out_shape,
        grid_spec=pl.GridSpec(
            grid=grid, in_specs=[x_spec, pe_spec, m_spec], out_specs=x_spec
        ),
        compiler_params=compiler_params,
    )(x_p, pe, keep)
    return y[..., :D] if D_p != D else y


# ----------------------------------------------------------------------------
# ConcatSquashLinear: ret = (x @ Wl + bl) * sigmoid(ctx @ Wg + bg) + ctx @ Wb
#   * batch-tiled grid (Bt batches per step) instead of one batch per step
#   * gate/bias computed once per block as a (Bt, C) @ (C, Dout) matmul
#   * (Bt, N_p, Din_p) reshaped (layout-free, N_p % 8 == 0) to one dense
#     (Bt*N_p, Din_p) @ (Din_p, Dout_p) MXU matmul
#   * all dims padded to lane/sublane-friendly sizes in the wrapper
# ----------------------------------------------------------------------------
def _concat_squash_kernel(ctx_ref, x_ref, wl_ref, bl_ref, wg_ref, bg_ref, wb_ref, o_ref):
    c = ctx_ref[...]                                                   # (Bt, C_p)
    gate = jax.nn.sigmoid(
        jnp.dot(c, wg_ref[...], preferred_element_type=jnp.float32) + bg_ref[...]
    )                                                                  # (Bt, Dout_p) f32
    bias = jnp.dot(c, wb_ref[...], preferred_element_type=jnp.float32)  # (Bt, Dout_p) f32

    bt, n_p, din_p = x_ref.shape
    xb = x_ref[...].reshape(bt * n_p, din_p)                           # free: n_p % 8 == 0
    h = jnp.dot(xb, wl_ref[...], preferred_element_type=jnp.float32) + bl_ref[...]
    h = h.reshape(bt, n_p, h.shape[-1])                                # (Bt, N_p, Dout_p)
    o_ref[...] = (h * gate[:, None, :] + bias[:, None, :]).astype(o_ref.dtype)


def concat_squash_linear(ctx: jnp.ndarray, x: jnp.ndarray, params: dict,
                         *, batch_tile: int | None = None) -> jnp.ndarray:
    """ctx: (B, 1, C); x: (B, N, Din) -> (B, N, Dout).
    params uses torch layouts: wl (Dout, Din), bl (Dout,), wg (Dout, C), bg (Dout,), wb (Dout, C)."""
    B, N, Din = x.shape
    C = ctx.shape[-1]
    Dout = params["wl"].shape[0]
    dt = x.dtype
    sub = 8 if jnp.dtype(dt).itemsize >= 4 else 16

    # Pad everything to unmasked MXU/VPU shapes; slice the result afterwards.
    Din_p = _round_up(Din, 128)
    Dout_p = _round_up(Dout, 128)
    C_p = _round_up(C, 128)
    N_p = _round_up(N, sub)

    if batch_tile is None:
        bt = max(1, 256 // N_p)                   # ~256 MXU rows per grid step
        batch_tile = B if bt >= B else max(8, (bt // 8) * 8)
    B_p = _round_up(B, batch_tile)

    ctx2 = jnp.pad(ctx.reshape(B, C), ((0, B_p - B), (0, C_p - C))).astype(dt)
    x_p = jnp.pad(x, ((0, B_p - B), (0, N_p - N), (0, Din_p - Din)))

    # Weights stay in the activation dtype (bf16-native MXU when dt is bf16);
    # accumulation is forced to f32 via preferred_element_type.
    wl_t = jnp.pad(params["wl"].T, ((0, Din_p - Din), (0, Dout_p - Dout))).astype(dt)
    wg_t = jnp.pad(params["wg"].T, ((0, C_p - C), (0, Dout_p - Dout))).astype(dt)
    wb_t = jnp.pad(params["wb"].T, ((0, C_p - C), (0, Dout_p - Dout))).astype(dt)
    bl = jnp.pad(params["bl"].reshape(1, Dout), ((0, 0), (0, Dout_p - Dout))).astype(jnp.float32)
    bg = jnp.pad(params["bg"].reshape(1, Dout), ((0, 0), (0, Dout_p - Dout))).astype(jnp.float32)

    grid = (B_p // batch_tile,)
    grid_spec = pl.GridSpec(
        grid=grid,
        in_specs=[
            pl.BlockSpec((batch_tile, C_p), lambda b: (b, 0)),
            pl.BlockSpec((batch_tile, N_p, Din_p), lambda b: (b, 0, 0)),
            pl.BlockSpec((Din_p, Dout_p), lambda b: (0, 0)),
            pl.BlockSpec((1, Dout_p), lambda b: (0, 0)),
            pl.BlockSpec((C_p, Dout_p), lambda b: (0, 0)),
            pl.BlockSpec((1, Dout_p), lambda b: (0, 0)),
            pl.BlockSpec((C_p, Dout_p), lambda b: (0, 0)),
        ],
        out_specs=pl.BlockSpec((batch_tile, N_p, Dout_p), lambda b: (b, 0, 0)),
    )
    out = pl.pallas_call(
        _concat_squash_kernel,
        out_shape=jax.ShapeDtypeStruct((B_p, N_p, Dout_p), dt),
        grid_spec=grid_spec,
        compiler_params=pltpu.CompilerParams(
            dimension_semantics=("parallel",),
            vmem_limit_bytes=48 * 1024 * 1024,
        ),
    )(ctx2, x_p, wl_t, bl, wg_t, bg, wb_t)
    return out[:B, :N, :Dout]


# ----------------------------------------------------------------------------
# Demo / correctness checks (small shapes)
# ----------------------------------------------------------------------------
if __name__ == "__main__":
    key = jax.random.PRNGKey(0)
    k1, k2, k3, k4, kdrop = jax.random.split(key, 5)

    # ---- PositionalEncoding: (S, B, d_model) seq-first ----
    S, B, D = 10, 2, 32
    max_len = 200
    x = jax.random.normal(k1, (S, B, D), dtype=jnp.float32)
    pe_table = make_positional_encoding_table(D, max_len)     # (200, 32)

    # Eval mode (dropout = identity) -> exact reference check.
    y = positional_encoding_forward(x, pe_table, p=0.1, training=False)
    y = jax.block_until_ready(y)
    y_ref = x + pe_table[:S][:, None, :]
    assert y.shape == (S, B, D)
    assert jnp.allclose(y, y_ref, atol=1e-6, rtol=1e-6), "PE eval mismatch"

    # Training mode (inverted dropout, int8 keep mask streamed to the kernel).
    # The reference regenerates the identical mask, so the check is exact.
    p = 0.25
    y_tr = positional_encoding_forward(x, pe_table, p=p, training=True, rng_key=kdrop)
    y_tr = jax.block_until_ready(y_tr)
    keep = jax.random.bernoulli(kdrop, 1.0 - p, (S, B, D))
    scale_ref = keep.astype(jnp.float32) * (1.0 / (1.0 - p))
    y_tr_ref = (x + pe_table[:S][:, None, :]) * scale_ref
    assert jnp.allclose(y_tr, y_tr_ref, atol=1e-5, rtol=1e-5), "PE dropout mismatch"

    # ---- ConcatSquashLinear (e.g. concat1 of MotionDiff) ----
    Bc, N, Din, Dout, C = 2, 10, 32, 16, 19      # C = rnn_output_dim + 3 style
    ctx = jax.random.normal(k2, (Bc, 1, C), dtype=jnp.float32)
    xc = jax.random.normal(k3, (Bc, N, Din), dtype=jnp.float32)
    wkeys = jax.random.split(k4, 5)
    params = {
        "wl": 0.1 * jax.random.normal(wkeys[0], (Dout, Din), jnp.float32),
        "bl": 0.1 * jax.random.normal(wkeys[1], (Dout,), jnp.float32),
        "wg": 0.1 * jax.random.normal(wkeys[2], (Dout, C), jnp.float32),
        "bg": 0.1 * jax.random.normal(wkeys[3], (Dout,), jnp.float32),
        "wb": 0.1 * jax.random.normal(wkeys[4], (Dout, C), jnp.float32),
    }
    out = concat_squash_linear(ctx, xc, params)
    out = jax.block_until_ready(out)

    gate_ref = jax.nn.sigmoid(jnp.einsum("buc,dc->bud", ctx, params["wg"]) + params["bg"])
    bias_ref = jnp.einsum("buc,dc->bud", ctx, params["wb"])
    csl_ref = (jnp.einsum("bni,oi->bno", xc, params["wl"]) + params["bl"]) * gate_ref + bias_ref
    assert out.shape == (Bc, N, Dout)
    assert jnp.allclose(out, csl_ref, atol=1e-4, rtol=1e-4), "ConcatSquashLinear mismatch"

    print("KERNEL_OK")
</pallas_src>

<mosaic_0001>
module attributes {stable_mosaic.version = 11 : i64} {
  func.func @_pe_add_kernel(%arg0: i32, %arg1: memref<10x2x128xf32, #tpu.memory_space<vmem>>, %arg2: memref<10x1x128xf32, #tpu.memory_space<vmem>>, %arg3: memref<10x2x128xf32, #tpu.memory_space<vmem>>) attributes {dimension_semantics = [#tpu.dimension_semantics<parallel>], iteration_bounds = array<i64: 1>, scalar_prefetch = 0 : i64, scratch_operands = 0 : i64, tpu.core_type = #tpu.core_type<tc>, window_params = [{transform_indices = @transform_0, window_bounds = array<i64: 10, 2, 128>}, {transform_indices = @transform_1, window_bounds = array<i64: 10, 1, 128>}, {transform_indices = @transform_2, window_bounds = array<i64: 10, 2, 128>}]} {
    %c0 = arith.constant 0 : index
    %c0_0 = arith.constant 0 : index
    %c0_1 = arith.constant 0 : index
    %0 = vector.load %arg1[%c0, %c0_0, %c0_1] : memref<10x2x128xf32, #tpu.memory_space<vmem>>, vector<10x2x128xf32>
    %c0_2 = arith.constant 0 : index
    %c0_3 = arith.constant 0 : index
    %c0_4 = arith.constant 0 : index
    %1 = vector.load %arg2[%c0_2, %c0_3, %c0_4] : memref<10x1x128xf32, #tpu.memory_space<vmem>>, vector<10x1x128xf32>
    %2 = vector.broadcast %1 : vector<10x1x128xf32> to vector<10x2x128xf32>
    %3 = arith.addf %0, %2 : vector<10x2x128xf32>
    %c0_5 = arith.constant 0 : index
    %c0_6 = arith.constant 0 : index
    %c0_7 = arith.constant 0 : index
    %4 = vector.load %arg3[%c0_5, %c0_6, %c0_7] : memref<10x2x128xf32, #tpu.memory_space<vmem>>, vector<10x2x128xf32>
    tpu.vector_store %arg3[%c0_5, %c0_6, %c0_7], %3 {strides = array<i32>} : memref<10x2x128xf32, #tpu.memory_space<vmem>>, vector<10x2x128xf32>,
    return
  }
  func.func @transform_0(%arg0: i32) -> (i32, i32, i32) {
    %c0_i32 = arith.constant 0 : i32
    %c0_i32_0 = arith.constant 0 : i32
    %c0_i32_1 = arith.constant 0 : i32
    return %arg0, %c0_i32, %c0_i32_0 : i32, i32, i32
  }
  func.func @transform_1(%arg0: i32) -> (i32, i32, i32) {
    %c0_i32 = arith.constant 0 : i32
    %c0_i32_0 = arith.constant 0 : i32
    %c0_i32_1 = arith.constant 0 : i32
    return %arg0, %c0_i32, %c0_i32_0 : i32, i32, i32
  }
  func.func @transform_2(%arg0: i32) -> (i32, i32, i32) {
    %c0_i32 = arith.constant 0 : i32
    %c0_i32_0 = arith.constant 0 : i32
    %c0_i32_1 = arith.constant 0 : i32
    return %arg0, %c0_i32, %c0_i32_0 : i32, i32, i32
  }
}

</mosaic_0001>

<bundles_post_ra>
// kernel: tpu_custom_call.1
= control target key start
LH: loop header
LB: loop body
LE: loop exit
PB: predicated region body
PF: predicated region fallthrough
CT: control target
= control target key end

     0   :  { %7 = vsyncpa [#allocation3], 0  ;;  %s273_s0 = inlined_call_operand.hbm [shape: f32[10,2,128], index: 0, kind: input, shape index: {}]   ;;  %s274_s1 = inlined_call_operand.hbm [shape: f32[10,1,128], index: 1, kind: input, shape index: {}]   ;;  %s275_s2 = inlined_call_operand.hbm [shape: f32[10,2,128], index: 2, kind: output, shape index: {}]  }
   0x1   :  { %8 = vsyncpa [#allocation6], 0 }
   0x2   :  { %9 = vsyncpa [#allocation4], 0  ;;  %s14_s11 = sshll.u32 %s273_s0, 4  ;;  %s229_s12 = smov [#allocation2]   ;;  %s15_s11 = int_to_ptr.hbm [resolvable:$true] %s14_s11 }
   0x3   :  { %s16_s13 = sshll.u32 %s229_s12, 4  ;;  %s27_s16 = sshll.u32 %s274_s1, 4  ;;  %s17_s13 = int_to_ptr.vmem [resolvable:$true] %s16_s13  ;;  %s28_s16 = int_to_ptr.hbm [resolvable:$true] %s27_s16 }
   0x4   :  { %s230_s17 = smov 32   ;;  %s231_s18 = smov 2  }
   0x5   :  { %22 = dma.hbm_to_vmem [thread:$0]  %s15_s11, 320, %s17_s13, [#allocation3], %s230_s17, %s230_s17, %s231_s18  }
   0x6   :  { %s232_s19 = smov [#allocation5]   ;;  %s233_s21 = smov 16  }
   0x7   :  { %s29_s20 = sshll.u32 %s232_s19, 4  ;;  %s234_s0 = smov 1   ;;  %s30_s20 = int_to_ptr.vmem [resolvable:$true] %s29_s20 }
   0x8   :  { %35 = dma.hbm_to_vmem [thread:$0]  %s28_s16, 160, %s30_s20, [#allocation6], %s233_s21, %s233_s21, %s234_s0  }
   0x9   :  { %223 = dma.done.wait [#allocation3], 320  }
   0xa   :  { %224 = vsyncadd [#allocation3], 4294966976 }
   0xb   :  { %225 = dma.done.wait [#allocation6], 160  }
   0xc   :  { %226 = vsyncadd [#allocation6], 4294967136  ;;  %s235_s22 = smov [#allocation7]   ;;  %s120_s25 = sshll.u32 %s275_s2, 4  ;;  %v44_v0 = vld [vmem:[#allocation2] sm:$0x3]  ;;  %s121_s25 = int_to_ptr.hbm [resolvable:$true] %s120_s25 }
   0xd   :  { %s260_s23 = sshll.u32 %s235_s22, 4  ;;  %v141_v1 = vld [vmem:[#allocation5] ss:$0 sm:$0xff]  ;;  %v45_v2 = vld [vmem:[#allocation2 + $0x2] sm:$0x3]  ;;  %s119_s23 = int_to_ptr.vmem [resolvable:$true] %s260_s23 }
   0xe   :  { %v142_v3 = vld [vmem:[#allocation5 + $0x1] ss:$0 sm:$0xff]  ;;  %v94_v4 = vadd.f32 %v141_v1, %v44_v0  ;;  %v46_v5 = vld [vmem:[#allocation2 + $0x4] sm:$0x3]  ;;  %v143_v6 = vld [vmem:[#allocation5 + $0x2] ss:$0 sm:$0xff] }
   0xf   :  { %v95_v7 = vadd.f32 %v142_v3, %v45_v2  ;;  %v47_v8 = vld [vmem:[#allocation2 + $0x6] sm:$0x3]  ;;  %v144_v9 = vld [vmem:[#allocation5 + $0x3] ss:$0 sm:$0xff]  ;;  %v96_v10 = vadd.f32 %v143_v6, %v46_v5  ;;  %v48_v11 = vld [vmem:[#allocation2 + $0x8] sm:$0x3] }
  0x10   :  { %104 = vst [vmem:[#allocation7] sm:$0x3] %v94_v4  ;;  %v97_v12 = vadd.f32 %v144_v9, %v47_v8  ;;  %v145_v13 = vld [vmem:[#allocation5 + $0x4] ss:$0 sm:$0xff]  ;;  %v49_v14 = vld [vmem:[#allocation2 + $0xa] sm:$0x3] }
  0x11   :  { %105 = vst [vmem:[#allocation7 + $0x2] sm:$0x3] %v95_v7  ;;  %v146_v15 = vld [vmem:[#allocation5 + $0x5] ss:$0 sm:$0xff]  ;;  %v98_v16 = vadd.f32 %v145_v13, %v48_v11  ;;  %v50_v17 = vld [vmem:[#allocation2 + $0xc] sm:$0x3] }
  0x12   :  { %106 = vst [vmem:[#allocation7 + $0x4] sm:$0x3] %v96_v10  ;;  %v99_v18 = vadd.f32 %v146_v15, %v49_v14  ;;  %v147_v19 = vld [vmem:[#allocation5 + $0x6] ss:$0 sm:$0xff]  ;;  %v51_v20 = vld [vmem:[#allocation2 + $0xe] sm:$0x3] }
  0x13   :  { %107 = vst [vmem:[#allocation7 + $0x6] sm:$0x3] %v97_v12  ;;  %v148_v21 = vld [vmem:[#allocation5 + $0x7] ss:$0 sm:$0xff]  ;;  %v52_v22 = vld [vmem:[#allocation2 + $0x10] sm:$0x3]  ;;  %v100_v23 = vadd.f32 %v147_v19, %v50_v17 }
  0x14   :  { %108 = vst [vmem:[#allocation7 + $0x8] sm:$0x3] %v98_v16  ;;  %v149_v24 = vld [vmem:[#allocation5 + $0x8] ss:$0 sm:$0xff]  ;;  %v101_v25 = vadd.f32 %v148_v21, %v51_v20  ;;  %v53_v26 = vld [vmem:[#allocation2 + $0x12] sm:$0x3] }
  0x15   :  { %109 = vst [vmem:[#allocation7 + $0xa] sm:$0x3] %v99_v18  ;;  %v150_v27 = vld [vmem:[#allocation5 + $0x9] ss:$0 sm:$0xff]  ;;  %v102_v28 = vadd.f32 %v149_v24, %v52_v22 }
  0x16   :  { %110 = vst [vmem:[#allocation7 + $0xc] sm:$0x3] %v100_v23  ;;  %v103_v29 = vadd.f32 %v150_v27, %v53_v26 }
  0x17   :  { %111 = vst [vmem:[#allocation7 + $0xe] sm:$0x3] %v101_v25 }
  0x18   :  { %112 = vst [vmem:[#allocation7 + $0x10] sm:$0x3] %v102_v28 }
  0x19   :  { %113 = vst [vmem:[#allocation7 + $0x12] sm:$0x3] %v103_v29 }
  0x1a   :  { %126 = dma.vmem_to_hbm [thread:$0]  %s119_s23, 320, %s121_s25, [#allocation4], %s230_s17, %s230_s17, %s231_s18  }
  0x1b   :  { %227 = dma.done.wait [#allocation4], 320  }
  0x1c   :  { %228 = vsyncadd [#allocation4], 4294966976 }
  0x1d   :  { %131 = vsyncpa [#allocation3], 1 }
  0x1e   :  { %132 = vsyncpa [#allocation6], 1 }
  0x1f   :  { %133 = vsyncpa [#allocation4], 1 }

</bundles_post_ra>
